<compile_context>
chip_gen: v7x
topology: tpu7x:2x2x1
jax: 0.10.0
libtpu: 0.0.40
codegen_flags: <defaults>
</compile_context>

<pallas_src>
import jax
import jax.numpy as jnp
from jax.experimental import pallas as pl
from jax.experimental.pallas import tpu as pltpu


def _round_up(x, m):
    return ((x + m - 1) // m) * m


def _cdiv(a, b):
    return -(-a // b)


def _row_loss_contrib(x, conf, row_valid):
    """Per-row sum_c log_softmax(x)*conf via the algebraic rewrite.

    sum_c (x - m - lse) * conf = sum_c(x*conf) - (m + lse) * sum_c(conf)
    Only per-row reduces (XLU) + one EUP exp pass; no full-tile logsm or product
    tensor is materialized.  Invalid (out-of-bounds) rows contribute exactly 0.
    """
    m = jnp.max(x, axis=1, keepdims=True)
    lse = jnp.log(jnp.sum(jnp.exp(x - m), axis=1, keepdims=True))
    s_xc = jnp.sum(x * conf, axis=1, keepdims=True)
    s_c = jnp.sum(conf, axis=1, keepdims=True)
    contrib = s_xc - (m + lse) * s_c
    return jnp.where(row_valid, contrib, 0.0)


def partial_loss_forward(outputs, confidence, index, *, tile_b=None,
                         fuse_max_rows=512, fuse_table_bytes=2 * 1024 * 1024):
    """JAX wrapper around the Pallas kernel (== PartialLoss.forward)."""
    B, C = outputs.shape
    N = confidence.shape[0]
    x_item = outputs.dtype.itemsize
    c_item = confidence.dtype.itemsize

    # --- Tile selection: biggest batch tile that keeps one logits buffer around
    # ~4 MiB (512-1024 row tiles sit near the HBM roofline) while the full
    # double-buffered budget stays inside v5e's 16 MiB default scoped VMEM.
    if tile_b is None:
        cap_rows = max(8, ((4 * 1024 * 1024) // max(C * x_item, 1)) // 8 * 8)
        tile_b = min(_round_up(B, 8), cap_rows, 1024)
    tile_b = max(8, _round_up(int(tile_b), 8))

    n_tiles = _cdiv(B, tile_b)
    # Two contiguous batch halves feed the two TensorCores of v7x; only split
    # when the tile count divides evenly so no grid step is fully out of bounds.
    num_splits = 2 if (n_tiles >= 2 and n_tiles % 2 == 0) else 1
    tiles_per_split = n_tiles // num_splits

    # Fuse the confidence-row gather only while the one-hot intermediate
    # (tile_b x N) and the VMEM-resident table stay small.
    fused = (N <= fuse_max_rows) and (N * C * c_item <= fuse_table_bytes)

    # --- VMEM budget (the pipeline double-buffers every input block).
    x_blk = tile_b * C * x_item
    out_blk = 8 * 128 * 4
    if fused:
        vmem_need = 2 * x_blk + 2 * (tile_b * 4) + 2 * (N * C * c_item) + out_blk
    else:
        vmem_need = 2 * x_blk + 2 * (tile_b * C * c_item) + out_blk
    vmem_limit = int(min(max(2 * vmem_need + (2 << 20), 16 << 20), 48 << 20))

    # --- Grid semantics: CORE_PARALLEL shards the split axis across v7x's two
    # TensorCores; on single-TC chips (v5e/v6e) a plain "parallel" axis is used.
    kind = ""
    try:
        kind = jax.devices()[0].device_kind.lower()
    except Exception:
        pass
    if num_splits > 1 and "v7" in kind:
        dim_sem = (pltpu.CORE_PARALLEL, pltpu.ARBITRARY)
    else:
        dim_sem = ("parallel", "arbitrary")

    cparams = pltpu.CompilerParams(dimension_semantics=dim_sem,
                                   vmem_limit_bytes=vmem_limit)

    out_shape = jax.ShapeDtypeStruct((num_splits, 8, 128), jnp.float32)
    out_spec = pl.BlockSpec((1, 8, 128), lambda s, i: (s, 0, 0))
    row_map = lambda s, i: (s * tiles_per_split + i, 0)
    grid = (num_splits, tiles_per_split)

    def _accumulate(x_ref, conf_rows, out_ref):
        s = pl.program_id(0)
        i = pl.program_id(1)

        @pl.when(i == 0)
        def _():
            out_ref[...] = jnp.zeros_like(out_ref)

        x = x_ref[...].astype(jnp.float32)
        tb = x_ref.shape[0]
        # Mask rows past the true batch size (cdiv grid, no host-side padding).
        row0 = (s * pl.num_programs(1) + i) * tb
        rows = row0 + jax.lax.broadcasted_iota(jnp.int32, (tb, 1), 0)
        contrib = _row_loss_contrib(x, conf_rows, rows < B)
        # Scalar accumulate into the resident lane-dense output block (1 vreg RMW).
        out_ref[...] += jnp.sum(contrib)

    def _kernel_fused(x_ref, idx_ref, conf_ref, out_ref):
        # Exact row gather from the VMEM-resident table via a one-hot matmul on
        # the otherwise-idle MXU (taken only when N is small -- see `fused` gate).
        idx = idx_ref[...]                                   # (tile_b, 1) int32
        tb = x_ref.shape[0]
        nrows = conf_ref.shape[0]
        onehot = (idx == jax.lax.broadcasted_iota(jnp.int32, (tb, nrows), 1))
        conf_rows = jnp.dot(onehot.astype(jnp.float32),
                            conf_ref[...].astype(jnp.float32),
                            preferred_element_type=jnp.float32)
        _accumulate(x_ref, conf_rows, out_ref)

    def _kernel_pregathered(x_ref, conf_ref, out_ref):
        _accumulate(x_ref, conf_ref[...].astype(jnp.float32), out_ref)

    if fused:
        idx2d = index.astype(jnp.int32).reshape(B, 1)
        partials = pl.pallas_call(
            _kernel_fused,
            out_shape=out_shape,
            grid_spec=pltpu.PrefetchScalarGridSpec(
                num_scalar_prefetch=0,
                grid=grid,
                in_specs=[
                    pl.BlockSpec((tile_b, C), row_map),          # logits tile (no pad)
                    pl.BlockSpec((tile_b, 1), row_map),          # indices tile
                    pl.BlockSpec((N, C), lambda s, i: (0, 0)),   # resident conf table
                ],
                out_specs=out_spec,
            ),
            compiler_params=cparams,
        )(outputs, idx2d, confidence)
    else:
        # Large-table fallback: rows pre-gathered by XLA, streamed per tile.
        conf_rows = jnp.take(confidence, index, axis=0)
        partials = pl.pallas_call(
            _kernel_pregathered,
            out_shape=out_shape,
            grid_spec=pltpu.PrefetchScalarGridSpec(
                num_scalar_prefetch=0,
                grid=grid,
                in_specs=[
                    pl.BlockSpec((tile_b, C), row_map),
                    pl.BlockSpec((tile_b, C), row_map),
                ],
                out_specs=out_spec,
            ),
            compiler_params=cparams,
        )(outputs, conf_rows)

    # -1/B scaling applied once, outside the hot loop.
    return -jnp.sum(partials[:, 0, 0]) / jnp.float32(B)


if __name__ == "__main__":
    key = jax.random.PRNGKey(0)
    B, C, N = 16, 16, 64          # batch, num_classes, dataset size (confidence rows)
    k1, k2, k3, k4 = jax.random.split(key, 4)

    # Model outputs (logits).
    outputs = jax.random.normal(k1, (B, C), dtype=jnp.float32)

    # Deterministic synthetic "confidence" parameter [N, C]: uniform over a random
    # candidate-label set, row-normalized (typical PLL initialization).
    cand = (jax.random.uniform(k2, (N, C)) < 0.3).astype(jnp.float32)
    cand = cand.at[jnp.arange(N), jax.random.randint(k3, (N,), 0, C)].set(1.0)
    confidence = cand / jnp.sum(cand, axis=1, keepdims=True)

    # Batch indices into the confidence table.
    index = jax.random.randint(k4, (B,), 0, N)

    # Pure-JAX reference of the PyTorch forward semantics.
    def ref_loss(o, conf, idx):
        logsm = jax.nn.log_softmax(o, axis=1)
        return -jnp.sum(logsm * conf[idx, :], axis=1).mean()

    ref = ref_loss(outputs, confidence, index)

    # 1) Default (fused in-kernel gather) path.
    loss = jax.block_until_ready(partial_loss_forward(outputs, confidence, index))
    assert jnp.allclose(loss, ref, rtol=1e-4, atol=1e-5), (loss, ref)

    # 2) Fallback (pre-gathered) path.
    loss_fb = jax.block_until_ready(
        partial_loss_forward(outputs, confidence, index, fuse_max_rows=0))
    assert jnp.allclose(loss_fb, ref, rtol=1e-4, atol=1e-5), (loss_fb, ref)

    # 3) Multi-tile / two-split path.
    loss_ms = jax.block_until_ready(
        partial_loss_forward(outputs, confidence, index, tile_b=8))
    assert jnp.allclose(loss_ms, ref, rtol=1e-4, atol=1e-5), (loss_ms, ref)

    # 4) Batch not a multiple of the tile (exercises in-kernel remainder masking).
    B2 = 19
    o2 = jax.random.normal(k1, (B2, C), dtype=jnp.float32)
    i2 = jax.random.randint(k4, (B2,), 0, N)
    ref2 = ref_loss(o2, confidence, i2)
    loss2 = jax.block_until_ready(partial_loss_forward(o2, confidence, i2, tile_b=8))
    assert jnp.allclose(loss2, ref2, rtol=1e-4, atol=1e-5), (loss2, ref2)

    print("KERNEL_OK")
</pallas_src>

<mosaic_0001>
module attributes {stable_mosaic.version = 11 : i64} {
  func.func @_kernel_fused(%arg0: i32, %arg1: i32, %arg2: memref<16x16xf32, #tpu.memory_space<vmem>>, %arg3: memref<16x1xi32, #tpu.memory_space<vmem>>, %arg4: memref<64x16xf32, #tpu.memory_space<vmem>>, %arg5: memref<1x8x128xf32, #tpu.memory_space<vmem>>) attributes {dimension_semantics = [#tpu.dimension_semantics<parallel>, #tpu.dimension_semantics<arbitrary>], iteration_bounds = array<i64: 1, 1>, scalar_prefetch = 0 : i64, scratch_operands = 0 : i64, tpu.core_type = #tpu.core_type<tc>, window_params = [{transform_indices = @transform_0, window_bounds = array<i64: 16, 16>}, {transform_indices = @transform_1, window_bounds = array<i64: 16, 1>}, {pipeline_mode = #tpu.pipeline_mode<synchronous>, transform_indices = @transform_2, window_bounds = array<i64: 64, 16>}, {transform_indices = @transform_3, window_bounds = array<i64: 1, 8, 128>}]} {
    %c0 = arith.constant 0 : index
    %c0_0 = arith.constant 0 : index
    %0 = vector.load %arg3[%c0, %c0_0] : memref<16x1xi32, #tpu.memory_space<vmem>>, vector<16x1xi32>
    %1 = tpu.iota {dimensions = array<i32: 1>} : vector<16x64xi32>
    %2 = vector.broadcast %0 : vector<16x1xi32> to vector<16x64xi32>
    %3 = arith.cmpi eq, %2, %1 : vector<16x64xi32>
    %4 = arith.extui %3 : vector<16x64xi1> to vector<16x64xi32>
    %5 = arith.sitofp %4 : vector<16x64xi32> to vector<16x64xf32>
    %c0_1 = arith.constant 0 : index
    %c0_2 = arith.constant 0 : index
    %6 = vector.load %arg4[%c0_1, %c0_2] : memref<64x16xf32, #tpu.memory_space<vmem>>, vector<64x16xf32>
    %cst = arith.constant dense<0.000000e+00> : vector<16x16xf32>
    %7 = tpu.matmul %5, %6, %cst {dimension_numbers = #tpu.dot_dimension_numbers<[1], [0], [0], [1], [0, 0, 1, 1], [], []>} : vector<16x64xf32>, vector<64x16xf32>, vector<16x16xf32> -> vector<16x16xf32>
    %c0_i32 = arith.constant 0 : i32
    %8 = arith.cmpi eq, %arg1, %c0_i32 : i32
    %9 = arith.extui %8 : i1 to i32
    %c0_i32_3 = arith.constant 0 : i32
    %10 = arith.cmpi ne, %9, %c0_i32_3 : i32
    scf.if %10 {
      %cst_19 = arith.constant 0.000000e+00 : f32
      %46 = vector.broadcast %cst_19 : f32 to vector<1x8x128xf32>
      %c0_20 = arith.constant 0 : index
      %c0_21 = arith.constant 0 : index
      %c0_22 = arith.constant 0 : index
      %47 = vector.load %arg5[%c0_20, %c0_21, %c0_22] : memref<1x8x128xf32, #tpu.memory_space<vmem>>, vector<1x8x128xf32>
      tpu.vector_store %arg5[%c0_20, %c0_21, %c0_22], %46 {strides = array<i32>} : memref<1x8x128xf32, #tpu.memory_space<vmem>>, vector<1x8x128xf32>,
    } else {
    }
    %c0_4 = arith.constant 0 : index
    %c0_5 = arith.constant 0 : index
    %11 = vector.load %arg2[%c0_4, %c0_5] : memref<16x16xf32, #tpu.memory_space<vmem>>, vector<16x16xf32>
    %c1_i32 = arith.constant 1 : i32
    %12 = arith.muli %arg0, %c1_i32 : i32
    %13 = arith.addi %12, %arg1 : i32
    %c16_i32 = arith.constant 16 : i32
    %14 = arith.muli %13, %c16_i32 : i32
    %15 = tpu.iota {dimensions = array<i32: 0>} : vector<16x1xi32>
    %16 = vector.broadcast %14 : i32 to vector<16x1xi32>
    %17 = arith.addi %16, %15 : vector<16x1xi32>
    %c16_i32_6 = arith.constant 16 : i32
    %18 = vector.broadcast %c16_i32_6 : i32 to vector<16x1xi32>
    %19 = arith.cmpi slt, %17, %18 : vector<16x1xi32>
    %cst_7 = arith.constant dense<0xFF800000> : vector<16xf32>
    %20 = vector.multi_reduction <maximumf>, %11, %cst_7 [1] : vector<16x16xf32> to vector<16xf32>
    %21 = vector.shape_cast %20 : vector<16xf32> to vector<16x1xf32>
    %22 = vector.broadcast %21 : vector<16x1xf32> to vector<16x16xf32>
    %23 = arith.subf %11, %22 : vector<16x16xf32>
    %24 = math.exp %23 : vector<16x16xf32>
    %cst_8 = arith.constant dense<0.000000e+00> : vector<16xf32>
    %25 = vector.multi_reduction <add>, %24, %cst_8 [1] : vector<16x16xf32> to vector<16xf32>
    %26 = vector.shape_cast %25 : vector<16xf32> to vector<16x1xf32>
    %27 = math.log %26 : vector<16x1xf32>
    %28 = arith.mulf %11, %7 : vector<16x16xf32>
    %cst_9 = arith.constant dense<0.000000e+00> : vector<16xf32>
    %29 = vector.multi_reduction <add>, %28, %cst_9 [1] : vector<16x16xf32> to vector<16xf32>
    %30 = vector.shape_cast %29 : vector<16xf32> to vector<16x1xf32>
    %cst_10 = arith.constant dense<0.000000e+00> : vector<16xf32>
    %31 = vector.multi_reduction <add>, %7, %cst_10 [1] : vector<16x16xf32> to vector<16xf32>
    %32 = vector.shape_cast %31 : vector<16xf32> to vector<16x1xf32>
    %33 = arith.addf %21, %27 : vector<16x1xf32>
    %34 = arith.mulf %33, %32 : vector<16x1xf32>
    %35 = arith.subf %30, %34 : vector<16x1xf32>
    %cst_11 = arith.constant 0.000000e+00 : f32
    %36 = vector.broadcast %cst_11 : f32 to vector<16x1xf32>
    %37 = arith.select %19, %35, %36 : vector<16x1xi1>, vector<16x1xf32>
    %c0_12 = arith.constant 0 : index
    %c0_13 = arith.constant 0 : index
    %c0_14 = arith.constant 0 : index
    %38 = vector.load %arg5[%c0_12, %c0_13, %c0_14] : memref<1x8x128xf32, #tpu.memory_space<vmem>>, vector<1x8x128xf32>
    %39 = vector.shape_cast %37 : vector<16x1xf32> to vector<1x16x1xf32>
    %cst_15 = arith.constant dense<0.000000e+00> : vector<1xf32>
    %40 = vector.multi_reduction <add>, %39, %cst_15 [1, 2] : vector<1x16x1xf32> to vector<1xf32>
    %41 = vector.shape_cast %40 : vector<1xf32> to vector<1x1x1xf32>
    %42 = vector.extract %41[0, 0, 0] : f32 from vector<1x1x1xf32>
    %43 = vector.broadcast %42 : f32 to vector<1x8x128xf32>
    %44 = arith.addf %38, %43 : vector<1x8x128xf32>
    %c0_16 = arith.constant 0 : index
    %c0_17 = arith.constant 0 : index
    %c0_18 = arith.constant 0 : index
    %45 = vector.load %arg5[%c0_16, %c0_17, %c0_18] : memref<1x8x128xf32, #tpu.memory_space<vmem>>, vector<1x8x128xf32>
    tpu.vector_store %arg5[%c0_16, %c0_17, %c0_18], %44 {strides = array<i32>} : memref<1x8x128xf32, #tpu.memory_space<vmem>>, vector<1x8x128xf32>,
    return
  }
  func.func @transform_0(%arg0: i32, %arg1: i32) -> (i32, i32) {
    %c1_i32 = arith.constant 1 : i32
    %0 = arith.muli %arg0, %c1_i32 : i32
    %1 = arith.addi %0, %arg1 : i32
    %c0_i32 = arith.constant 0 : i32
    %c0_i32_0 = arith.constant 0 : i32
    return %1, %c0_i32 : i32, i32
  }
  func.func @transform_1(%arg0: i32, %arg1: i32) -> (i32, i32) {
    %c1_i32 = arith.constant 1 : i32
    %0 = arith.muli %arg0, %c1_i32 : i32
    %1 = arith.addi %0, %arg1 : i32
    %c0_i32 = arith.constant 0 : i32
    %c0_i32_0 = arith.constant 0 : i32
    return %1, %c0_i32 : i32, i32
  }
  func.func @transform_2(%arg0: i32, %arg1: i32) -> (i32, i32) {
    %c0_i32 = arith.constant 0 : i32
    %c0_i32_0 = arith.constant 0 : i32
    %c0_i32_1 = arith.constant 0 : i32
    return %c0_i32, %c0_i32_0 : i32, i32
  }
  func.func @transform_3(%arg0: i32, %arg1: i32) -> (i32, i32, i32) {
    %c0_i32 = arith.constant 0 : i32
    %c0_i32_0 = arith.constant 0 : i32
    %c0_i32_1 = arith.constant 0 : i32
    return %arg0, %c0_i32, %c0_i32_0 : i32, i32, i32
  }
}

</mosaic_0001>

<bundles_post_ra>
// kernel: tpu_custom_call.1
= control target key start
LH: loop header
LB: loop body
LE: loop exit
PB: predicated region body
PF: predicated region fallthrough
CT: control target
= control target key end

     0   :  { %vm182_vm0 = vcmask 130048   ;;  %v357_v2 = vmov 0   ;;  %s441_s0 = inlined_call_operand.vmem [shape: f32[16,16], index: 0, kind: input, shape index: {}]   ;;  %s442_s1 = inlined_call_operand.vmem [shape: s32[16,1], index: 1, kind: input, shape index: {}]   ;;  %s443_s2 = inlined_call_operand.vmem [shape: f32[64,16], index: 2, kind: input, shape index: {}]   ;;  %s444_s3 = inlined_call_operand.hbm [shape: f32[1,8,128], index: 3, kind: output, shape index: {}]  }
   0x1   :  { %v59_v0 = vld [vmem:[%s442_s1] sm:$0xff]  ;;  %324 = vset.pattern.permute.xlu0 %v357_v2  ;;  %v171_v4 = vld [vmem:[%s441_s0 + $0x8] sm:$0xff]  ;;  %v77_v8 = vld [vmem:[%s443_s2 + $0x10] sm:$0xff] }
   0x2   :  { %v386_v1 = vld [vmem:[%s441_s0] sm:$0xff]  ;;  %v76_v6 = vld [vmem:[%s443_s2 + $0x8] sm:$0xff]  ;;  %64 = vperm.xlu0 %324, %v59_v0   ;;  %v78_v9 = vld [vmem:[%s443_s2 + $0x18] sm:$0xff]  ;;  %v186_v11 = vsel %vm182_vm0, %v171_v4, -inf }
   0x3   :  { %v183_v3 = vsel %vm182_vm0, %v386_v1, -inf  ;;  %v75_v5 = vld [vmem:[%s443_s2] sm:$0xff]  ;;  %v60_v10 = vld [vmem:[%s442_s1 + $0x8] sm:$0xff]  ;;  %v307_v12 = vpack.c.bf16 %v78_v9, %v77_v8 }
   0x4   :  { %184 = vmax.xlane.f32.xlu1 %v183_v3  ;;  %v303_v7 = vpack.c.bf16 %v76_v6, %v75_v5  ;;  %v79_v13 = vld [vmem:[%s443_s2 + $0x20] sm:$0xff]  ;;  %v80_v14 = vld [vmem:[%s443_s2 + $0x28] sm:$0xff] }
   0x6   :  { %304 = vmatprep.subr.bf16.mxu0 %v303_v7 }
   0x7   :  { %8 = vsyncpa [#allocation3], 0  ;;  %306 = vmatpush3.bf16.msra.mxu0 %v303_v7  ;;  %67 = vperm.xlu0 %324, %v60_v10   ;;  %v311_v15 = vpack.c.bf16 %v80_v14, %v79_v13  ;;  %v81_v16 = vld [vmem:[%s443_s2 + $0x30] sm:$0xff]  ;;  %v82_v17 = vld [vmem:[%s443_s2 + $0x38] sm:$0xff]  ;;  %v61_v19 = vlaneseq  ;;  %vm83_vm1 = vcmask 523264   ;;  %v358_v22 = vmov 0.0  }
   0x8   :  { %187 = vmax.xlane.f32.xlu1 %v186_v11  ;;  %308 = vmatprep.subr.bf16.mxu0 %v307_v12  ;;  %v315_v18 = vpack.c.bf16 %v82_v17, %v81_v16  ;;  %vm228_vm4 = vcmask 7168   ;;  %s359_s2 = smov [#allocation2]  }
   0x9   :  { %v62_v20 = vand.u32 127, %v61_v19  ;;  %s250_s7 = sshll.u32 %s359_s2, 4  ;;  %s251_s7 = int_to_ptr.vmem [resolvable:$true] %s250_s7 }
   0xa   :  { %s333_s9 = scalar_lea.vmem %s251_s7, 128  ;;  %p338_p1 = scmp.lt.s32.totalorder %s251_s7, %s251_s7 }
   0xb   :  { %310 = vmatpush3.bf16.msra.mxu0 %v307_v12  ;;  %p334_p0 = scmp.ne.s32.totalorder %s251_s7, %s333_s9  ;;  %p339_p2 = scmp.lt.s32.totalorder %s333_s9, %s333_s9 }
   0xc   :  { %312 = vmatprep.subr.bf16.mxu0 %v311_v15 }
   0xd   :  { %p340_p3 = por %p339_p2, %p338_p1 }
   0xf   :  { %314 = vmatpush3.bf16.msra.mxu0 %v311_v15  ;;  %p341_p4 = pnand %p340_p3, %p334_p0 }
  0x10   :  { %316 = vmatprep.subr.bf16.mxu0 %v315_v18 }
  0x13   :  { %318 = vmatpush3.bf16.msra.mxu0 %v315_v18 }
  0x81   :  { %v65_v21 = vpop.permute.xlu0 %64 }
  0x82   :  { %vm69_vm2 = vcmp.eq.s32.totalorder %v65_v21, %v62_v20 }
  0x83   :  { %v270_v23 = vsel %vm69_vm2, 1.0, %v358_v22 }
  0x84   :  { %300 = vmatprep.mubr.msk.f32.mxu0 %vm83_vm1, %v270_v23 }
  0x86   :  { %v68_v24 = vpop.permute.xlu0 %67 }
  0x87   :  { %vm70_vm3 = vcmp.eq.s32.totalorder %v68_v24, %v62_v20 }
  0x88   :  { %v271_v25 = vsel %vm70_vm3, 1.0, %v358_v22 }
  0x89   :  { %301 = vmatmul.mubr.msk.f32.vlgmr.msra.gmra.mrb[0].mxu0 %vm83_vm1, %v271_v25 }
  0x91   :  { %v185_v26 = vpop.xlane.xlu1 %184 }
  0x92   :  { %v189_v27 = vsub.f32 %v386_v1, %v185_v26 }
  0x94   :  { %v191_v28 = vmul.f32 1.442695, %v189_v27 }
  0x95   :  { %v188_v29 = vpop.xlane.xlu1 %187 }
  0x96   :  { %325 = vpow2.f32 %v191_v28  ;;  %v190_v30 = vsub.f32 %v171_v4, %v188_v29 }
  0x98   :  { %v193_v31 = vmul.f32 1.442695, %v190_v30 }
  0x9a   :  { %327 = vpow2.f32 %v193_v31 }
  0xa0   :  { %v326_v32 = vpop.eup %325 }
  0xa1   :  { %v195_v33 = vsel %vm182_vm0, %v326_v32, 0.0 }
  0xa2   :  { %196 = vadd.xlane.f32.xlu0 %v195_v33 }
  0xa4   :  { %v328_v34 = vpop.eup %327 }
  0xa5   :  { %v198_v35 = vsel %vm182_vm0, %v328_v34, 0.0 }
  0xa6   :  { %199 = vadd.xlane.f32.xlu1 %v198_v35 }
 0x12f   :  { %v197_v44 = vpop.xlane.xlu0 %196 }
 0x130   :  { %329 = vlog2.f32 %v197_v44 }
 0x133   :  { %v200_v45 = vpop.xlane.xlu1 %199 }
 0x134   :  { %331 = vlog2.f32 %v200_v45 }
 0x13a   :  { %v330_v46 = vpop.eup %329 }
 0x13b   :  { %v202_v49 = vmul.f32 0.6931472, %v330_v46 }
 0x13d   :  { %v219_v52 = vadd.f32 %v202_v49, %v185_v26 }
 0x13e   :  { %v332_v48 = vpop.eup %331 }
 0x13f   :  { %v204_v51 = vmul.f32 0.6931472, %v332_v48 }
 0x141   :  { %v220_v54 = vadd.f32 %v204_v51, %v188_v29 }
 0x15c   :  { %v302_v36 = vpop.f32.mrb[0].mxu0 }
 0x15d   :  { %v156_v37 = vpop.f32.mrb[1].mxu0  ;;  %v216_v38 = vsel %vm182_vm0, %v302_v36, 0.0  ;;  %v206_v41 = vmul.f32 %v302_v36, %v171_v4 }
 0x15e   :  { %217 = vadd.xlane.f32.xlu1 %v216_v38  ;;  %v205_v39 = vmul.f32 %v386_v1, %v156_v37  ;;  %v213_v40 = vsel %vm182_vm0, %v156_v37, 0.0 }
 0x15f   :  { %v210_v43 = vsel %vm182_vm0, %v206_v41, 0.0 }
 0x160   :  { %v207_v42 = vsel %vm182_vm0, %v205_v39, 0.0 }
 0x162   :  { %214 = vadd.xlane.f32.xlu1 %v213_v40 }
 0x166   :  { %208 = vadd.xlane.f32.xlu1 %v207_v42 }
 0x16a   :  { %211 = vadd.xlane.f32.xlu1 %v210_v43 }
 0x1eb   :  { %v218_v47 = vpop.xlane.xlu1 %217 }
 0x1ec   :  { %v222_v56 = vmul.f32 %v220_v54, %v218_v47 }
 0x1ef   :  { %v215_v50 = vpop.xlane.xlu1 %214 }
 0x1f0   :  { %v221_v55 = vmul.f32 %v219_v52, %v215_v50 }
 0x1f3   :  { %v209_v53 = vpop.xlane.xlu1 %208 }
 0x1f4   :  { %v223_v57 = vsub.f32 %v209_v53, %v221_v55 }
 0x1f6   :  { %v229_v60 = vsel %vm228_vm4, %v223_v57, 0.0 }
 0x1f7   :  { %v212_v58 = vpop.xlane.xlu1 %211 }
 0x1f8   :  { %v224_v59 = vsub.f32 %v212_v58, %v222_v56 }
 0x1fa   :  { %v230_v61 = vsel %vm228_vm4, %v224_v59, 0.0 }
 0x1fb   :  { %v231_v62 = vadd.f32 %v230_v61, %v229_v60 }
 0x1fd   :  { %232 = vadd.xlane.f32.xlu1 %v231_v62 }
 0x28a   :  { %v233_v63 = vpop.xlane.xlu1 %232 }
 0x28b   :  { %v234_v0 = vrot.slane %v233_v63, 4 }
 0x28d   :  { %v235_v1 = vadd.f32 %v234_v0, %v233_v63 }
 0x28f   :  { %v236_v2 = vrot.slane %v235_v1, 2 }
 0x291   :  { %v237_v3 = vadd.f32 %v236_v2, %v235_v1 }
 0x293   :  { %v238_v4 = vrot.slane %v237_v3, 1 }
 0x295   :  { %v239_v5 = vadd.f32 %v238_v4, %v237_v3 }
 0x297   :  { %319 = vpush %v239_v5 }
 0x2c8   :  { %s320_s8 = spop %319 }
 0x2c9   :  { %v241_v6 = vstv %s320_s8 }
 0x2ca   :  { %243 = vst [vmem:[#allocation2] sm:$0xff] %v241_v6 }
 0x2cb   :  { %344 = shalt.err (!%p341_p4)
}
 0x2cc   :  { %s345_s12 = scalar_lea.hbm %s444_s3, 128 }
 0x2cd   :  { %p346_p5 = scmp.ne.s32.totalorder %s444_s3, %s345_s12  ;;  %p349_p6 = scmp.lt.u32.totalorder %s345_s12, %s444_s3 }
 0x2cf   :  { %p351_p7 = pnand %p349_p6, %p346_p5 }
 0x2d1   :  { %354 = shalt.err (!%p351_p7)
}
 0x2d2   :  { %253 = dma.vmem_to_hbm [thread:$0]  %s251_s7, 128, %s444_s3, [#allocation3]  }
 0x2d3   :  { %355 = dma.done.wait [#allocation3], 128  }
 0x2d4   :  { %356 = vsyncadd [#allocation3], 4294967168 }
 0x2d5   :  { %257 = vsyncpa [#allocation3], 1 }

</bundles_post_ra>
